<compile_context>
chip_gen: v7x
topology: tpu7x:2x2x1
jax: 0.10.0
libtpu: 0.0.40
codegen_flags: <defaults>
</compile_context>

<pallas_src>
import functools

import jax
import jax.numpy as jnp
from jax.experimental import pallas as pl
from jax.experimental.pallas import tpu as pltpu

BLOCK_CONFIG = (6, 12, 24, 16)   # densenet121
GROWTH = 32
BN_SIZE = 4
NUM_INIT_FEATURES = 64
BN_EPS = 1e-5


def _round_up(x, m):
    return ((x + m - 1) // m) * m


# ----------------------------- Pallas kernels -----------------------------

def _mm_kernel(a_ref, b_ref, bias_ref, o_ref, *, act):
    """act(A @ B + bias), bf16 MXU operands, f32 accumulation."""
    a = a_ref[...].astype(jnp.bfloat16)
    r = jnp.dot(a, b_ref[...], preferred_element_type=jnp.float32)
    r = r + bias_ref[...]
    if act == "relu":
        r = jnp.maximum(r, 0.0)
    elif act == "sigmoid":
        r = jax.nn.sigmoid(r)
    o_ref[...] = r.astype(o_ref.dtype)


def _mm_bn_kernel(a_ref, b_ref, bias_ref, scale_ref, shift_ref, o_ref, *, act):
    """Pre-activation BN + ReLU fused into the A prologue, then bf16 matmul."""
    a = a_ref[...].astype(jnp.float32)
    a = jnp.maximum(a * scale_ref[...] + shift_ref[...], 0.0)   # BN affine + ReLU
    r = jnp.dot(a.astype(jnp.bfloat16), b_ref[...],
                preferred_element_type=jnp.float32)
    r = r + bias_ref[...]
    if act == "relu":
        r = jnp.maximum(r, 0.0)
    elif act == "sigmoid":
        r = jax.nn.sigmoid(r)
    o_ref[...] = r.astype(o_ref.dtype)


def _bn_stats_kernel(x_ref, sum_ref, sq_ref, *, m_total, tile_m):
    """Single-pass per-channel sum and sum-of-squares (row-tiled reduction)."""
    i = pl.program_id(0)

    @pl.when(i == 0)
    def _():
        sum_ref[...] = jnp.zeros_like(sum_ref)
        sq_ref[...] = jnp.zeros_like(sq_ref)

    x = x_ref[...]
    row = jax.lax.broadcasted_iota(jnp.int32, x.shape, 0) + i * tile_m
    x = jnp.where(row < m_total, x, 0.0)          # mask padded / ragged rows
    sum_ref[...] += jnp.sum(x, axis=0, keepdims=True)
    sq_ref[...] += jnp.sum(x * x, axis=0, keepdims=True)


def _bn_apply_kernel(x_ref, sc_ref, sh_ref, o_ref):
    o_ref[...] = jnp.maximum(
        x_ref[...] * sc_ref[...] + sh_ref[...], 0.0).astype(o_ref.dtype)


# ----------------------------- Pallas wrappers -----------------------------

def matmul_prepped(a, cp, prologue=None, act="none"):
    """act((prologue(a)) @ Wm + bias) with Wm pre-padded bf16 from init.

    a: (M, K) f32 or bf16.  cp: prepared conv/linear dict.
    prologue: optional (scale, shift) of shape (K,) -> fused BN+ReLU on A.
    """
    M, K = a.shape
    assert K == cp["k"]
    Kp, Np = cp["wm"].shape
    N = cp["cout"]

    M8 = _round_up(M, 8)
    if M8 != M or Kp != K:
        a = jnp.pad(a, ((0, M8 - M), (0, Kp - K)))

    tm = M8 if M8 <= 512 else 512
    gm = pl.cdiv(M8, tm)
    tn = 256 if Np % 256 == 0 else 128
    gn = Np // tn

    a_spec = pl.BlockSpec((tm, Kp), lambda i, j: (i, 0))
    b_spec = pl.BlockSpec((Kp, tn), lambda i, j: (0, j))
    bias_spec = pl.BlockSpec((1, tn), lambda i, j: (0, j))
    out_spec = pl.BlockSpec((tm, tn), lambda i, j: (i, j))

    if prologue is None:
        kernel = functools.partial(_mm_kernel, act=act)
        in_specs = [a_spec, b_spec, bias_spec]
        args = (a, cp["wm"], cp["bias"])
    else:
        scale, shift = prologue
        scale_p = jnp.pad(scale.reshape(1, K).astype(jnp.float32),
                          ((0, 0), (0, Kp - K)))
        shift_p = jnp.pad(shift.reshape(1, K).astype(jnp.float32),
                          ((0, 0), (0, Kp - K)))
        kernel = functools.partial(_mm_bn_kernel, act=act)
        vec_spec = pl.BlockSpec((1, Kp), lambda i, j: (0, 0))
        in_specs = [a_spec, b_spec, bias_spec, vec_spec, vec_spec]
        args = (a, cp["wm"], cp["bias"], scale_p, shift_p)

    out = pl.pallas_call(
        kernel,
        out_shape=jax.ShapeDtypeStruct((gm * tm, Np), jnp.float32),
        grid=(gm, gn),
        in_specs=in_specs,
        out_specs=out_spec,
        compiler_params=pltpu.CompilerParams(
            dimension_semantics=("parallel", "parallel")),
    )(*args)
    return out[:M, :N]


def bn_scale_shift(x2d, gamma, beta):
    """Batch-statistics BN (training mode, like the original) -> (scale, shift).

    One Pallas pass computes per-channel sum / sum-of-squares; the tiny (C,)
    arithmetic stays in plain JAX.
    """
    M, C = x2d.shape
    M8 = _round_up(M, 8)
    if M8 != M:
        x2d = jnp.pad(x2d, ((0, M8 - M), (0, 0)))
    tile_m = min(M8, 512)
    grid = (pl.cdiv(M8, tile_m),)

    s, sq = pl.pallas_call(
        functools.partial(_bn_stats_kernel, m_total=M, tile_m=tile_m),
        out_shape=(jax.ShapeDtypeStruct((1, C), jnp.float32),
                   jax.ShapeDtypeStruct((1, C), jnp.float32)),
        grid=grid,
        in_specs=[pl.BlockSpec((tile_m, C), lambda i: (i, 0))],
        out_specs=[pl.BlockSpec((1, C), lambda i: (0, 0)),
                   pl.BlockSpec((1, C), lambda i: (0, 0))],
        compiler_params=pltpu.CompilerParams(
            dimension_semantics=("arbitrary",)),
    )(x2d)

    mean = s[0] / M
    var = jnp.maximum(sq[0] / M - mean * mean, 0.0)
    scale = gamma.astype(jnp.float32) * jax.lax.rsqrt(var + BN_EPS)
    shift = beta.astype(jnp.float32) - mean * scale
    return scale, shift


def bn_relu_apply(x2d, scale, shift, out_dtype=jnp.float32):
    """Row-tiled, pipelined normalize + affine + ReLU (standalone BN path)."""
    M, C = x2d.shape
    M8 = _round_up(M, 8)
    if M8 != M:
        x2d = jnp.pad(x2d, ((0, M8 - M), (0, 0)))
    tile_m = min(M8, 512)

    out = pl.pallas_call(
        _bn_apply_kernel,
        out_shape=jax.ShapeDtypeStruct((M8, C), out_dtype),
        grid=(pl.cdiv(M8, tile_m),),
        in_specs=[pl.BlockSpec((tile_m, C), lambda i: (i, 0)),
                  pl.BlockSpec((1, C), lambda i: (0, 0)),
                  pl.BlockSpec((1, C), lambda i: (0, 0))],
        out_specs=pl.BlockSpec((tile_m, C), lambda i: (i, 0)),
        compiler_params=pltpu.CompilerParams(
            dimension_semantics=("parallel",)),
    )(x2d, scale.reshape(1, C), shift.reshape(1, C))
    return out[:M]


# ----------------------------- conv / pool glue -----------------------------

def conv2d_im2col(x, cp):
    """k x k conv (kh, kw > 1) via bf16 im2col + Pallas bf16 matmul.  x: NHWC."""
    # TODO(synk): the im2col patch gather is still materialized in plain JAX;
    # a tap-axis grid with manual DMA would remove this HBM blow-up entirely.
    kh, kw, stride, pad = cp["kh"], cp["kw"], cp["stride"], cp["pad"]
    N, H, W, C = x.shape
    Ho = (H + 2 * pad - kh) // stride + 1
    Wo = (W + 2 * pad - kw) // stride + 1
    xb = x.astype(jnp.bfloat16)
    if pad:
        xb = jnp.pad(xb, ((0, 0), (pad, pad), (pad, pad), (0, 0)))
    patches = []
    for di in range(kh):
        for dj in range(kw):
            patches.append(
                xb[:, di:di + stride * Ho:stride, dj:dj + stride * Wo:stride, :])
    cols = jnp.concatenate(patches, axis=-1).reshape(N * Ho * Wo, kh * kw * C)
    out = matmul_prepped(cols, cp)
    return out.reshape(N, Ho, Wo, cp["cout"])


def maxpool_3x3_s2_p1(x):
    # TODO(synk): 3x3/s2 max-pool done with lax.reduce_window (plain-JAX glue).
    return jax.lax.reduce_window(
        x, -jnp.inf, jax.lax.max,
        window_dimensions=(1, 3, 3, 1), window_strides=(1, 2, 2, 1),
        padding=((0, 0), (1, 1), (1, 1), (0, 0)))


def avgpool_2x2(x):
    N, H, W, C = x.shape
    return x.reshape(N, H // 2, 2, W // 2, 2, C).mean(axis=(2, 4))


# ----------------------------- parameters -----------------------------

class _Init:
    def __init__(self, key):
        self.key = key
        self.i = 0

    def normal(self, shape, std=0.05):
        self.i += 1
        k = jax.random.fold_in(self.key, self.i)
        return std * jax.random.normal(k, shape, jnp.float32)


def _prep_conv(w4d, stride=1, pad=0):
    """(Cout, Cin, kh, kw) PyTorch weight -> padded bf16 (Kp, Np) matmul slab."""
    cout, cin, kh, kw = w4d.shape
    K = kh * kw * cin
    Kp = _round_up(K, 128)
    Np = _round_up(cout, 128)
    wm = jnp.transpose(w4d, (2, 3, 1, 0)).reshape(K, cout)
    wm = jnp.pad(wm, ((0, Kp - K), (0, Np - cout))).astype(jnp.bfloat16)
    return {"wm": wm, "bias": jnp.zeros((1, Np), jnp.float32),
            "kh": kh, "kw": kw, "stride": stride, "pad": pad,
            "cin": cin, "cout": cout, "k": K}


def _prep_linear(w, b):
    """(Cout, Cin) weight + (Cout,) bias -> padded bf16 slab + f32 bias row."""
    cout, cin = w.shape
    Kp = _round_up(cin, 128)
    Np = _round_up(cout, 128)
    wm = jnp.pad(w.T, ((0, Kp - cin), (0, Np - cout))).astype(jnp.bfloat16)
    bias = jnp.pad(b.reshape(1, -1), ((0, 0), (0, Np - cout))).astype(jnp.float32)
    return {"wm": wm, "bias": bias, "kh": 1, "kw": 1, "stride": 1, "pad": 0,
            "cin": cin, "cout": cout, "k": cin}


def init_densenet121_params(key, num_classes):
    rng = _Init(key)
    p = {
        "conv0": _prep_conv(rng.normal((NUM_INIT_FEATURES, 3, 7, 7)),
                            stride=2, pad=3),
        "norm0_g": jnp.ones((NUM_INIT_FEATURES,), jnp.float32),
        "norm0_b": jnp.zeros((NUM_INIT_FEATURES,), jnp.float32),
        "blocks": [],
        "trans": [],
    }
    ch = NUM_INIT_FEATURES
    for b, n_layers in enumerate(BLOCK_CONFIG):
        layers = []
        for l in range(n_layers):
            cin = ch + l * GROWTH
            inter = BN_SIZE * GROWTH
            layers.append({
                "n1_g": jnp.ones((cin,), jnp.float32),
                "n1_b": jnp.zeros((cin,), jnp.float32),
                "c1": _prep_conv(rng.normal((inter, cin, 1, 1))),
                "n2_g": jnp.ones((inter,), jnp.float32),
                "n2_b": jnp.zeros((inter,), jnp.float32),
                "c2": _prep_conv(rng.normal((GROWTH, inter, 3, 3)),
                                 stride=1, pad=1),
            })
        p["blocks"].append(layers)
        ch += n_layers * GROWTH
        if b != len(BLOCK_CONFIG) - 1:
            p["trans"].append({
                "n_g": jnp.ones((ch,), jnp.float32),
                "n_b": jnp.zeros((ch,), jnp.float32),
                "c": _prep_conv(rng.normal((ch // 2, ch, 1, 1))),
            })
            ch //= 2
    p["norm5_g"] = jnp.ones((ch,), jnp.float32)
    p["norm5_b"] = jnp.zeros((ch,), jnp.float32)
    p["fc"] = _prep_linear(rng.normal((num_classes, ch)),
                           jnp.zeros((num_classes,), jnp.float32))
    return p


# ----------------------------- forward -----------------------------

def densenet121_forward(params, x_nchw):
    # NOTE: BatchNorm uses batch statistics (training mode), same as the
    # previous accepted version (torchvision eval would use running stats).
    x = jnp.transpose(x_nchw.astype(jnp.float32), (0, 2, 3, 1))  # NCHW -> NHWC

    # stem: conv0 (7x7/s2/p3) -> norm0 + relu -> maxpool
    x = conv2d_im2col(x, params["conv0"])
    N, H, W, C = x.shape
    x2 = x.reshape(N * H * W, C)
    sc, sh = bn_scale_shift(x2, params["norm0_g"], params["norm0_b"])
    x = bn_relu_apply(x2, sc, sh).reshape(N, H, W, C)
    x = maxpool_3x3_s2_p1(x)

    feat = x
    for b, n_layers in enumerate(BLOCK_CONFIG):
        for l in range(n_layers):
            lp = params["blocks"][b][l]
            N, H, W, C = feat.shape
            a = feat.reshape(N * H * W, C)
            # norm1 + relu1 fused into the 1x1 bottleneck conv's A prologue
            sc1, sh1 = bn_scale_shift(a, lp["n1_g"], lp["n1_b"])
            y = matmul_prepped(a, lp["c1"], prologue=(sc1, sh1))     # (M, 128)
            # norm2 + relu2 (standalone, emits bf16 for the 3x3 im2col)
            sc2, sh2 = bn_scale_shift(y, lp["n2_g"], lp["n2_b"])
            y = bn_relu_apply(y, sc2, sh2, out_dtype=jnp.bfloat16)
            y = y.reshape(N, H, W, -1)
            y = conv2d_im2col(y, lp["c2"])                           # 3x3, pad 1
            # TODO(synk): dense-block concat is still O(L) copies of the
            # growing feature map per layer (plain-JAX glue).
            feat = jnp.concatenate([feat, y], axis=-1)
        if b != len(BLOCK_CONFIG) - 1:
            tp = params["trans"][b]
            N, H, W, C = feat.shape
            a = feat.reshape(N * H * W, C)
            # transition norm + relu fused into the 1x1 compression conv
            sc, sh = bn_scale_shift(a, tp["n_g"], tp["n_b"])
            f = matmul_prepped(a, tp["c"], prologue=(sc, sh))
            feat = avgpool_2x2(f.reshape(N, H, W, -1))

    # norm5 + relu, global average pool, classifier (Linear + Sigmoid fused)
    N, H, W, C = feat.shape
    a = feat.reshape(N * H * W, C)
    sc, sh = bn_scale_shift(a, params["norm5_g"], params["norm5_b"])
    feat = bn_relu_apply(a, sc, sh).reshape(N, H, W, C)
    # TODO(synk): global average pool kept in plain JAX (tiny at this point).
    pooled = feat.mean(axis=(1, 2))                                  # (N, 1024)
    out = matmul_prepped(pooled, params["fc"], act="sigmoid")
    return out


# ----------------------------- main -----------------------------

if __name__ == "__main__":
    num_classes = 14  # CheXpert-style label count
    key = jax.random.PRNGKey(0)
    pkey, xkey = jax.random.split(key)

    params = init_densenet121_params(pkey, num_classes)
    x = jax.random.normal(xkey, (2, 3, 32, 32), jnp.float32)  # NCHW like PyTorch

    out = densenet121_forward(params, x)
    out = jax.block_until_ready(out)

    assert out.shape == (2, num_classes), out.shape
    assert bool(jnp.all(jnp.isfinite(out)))
    assert bool(jnp.all((out >= 0.0) & (out <= 1.0)))  # sigmoid outputs
    print("KERNEL_OK")
</pallas_src>

<mosaic_0001>
module attributes {stable_mosaic.version = 11 : i64} {
  func.func @_mm_kernel(%arg0: i32, %arg1: i32, %arg2: memref<512x256xbf16, #tpu.memory_space<vmem>>, %arg3: memref<256x128xbf16, #tpu.memory_space<vmem>>, %arg4: memref<1x128xf32, #tpu.memory_space<vmem>>, %arg5: memref<512x128xf32, #tpu.memory_space<vmem>>) attributes {dimension_semantics = [#tpu.dimension_semantics<parallel>, #tpu.dimension_semantics<parallel>], iteration_bounds = array<i64: 1, 1>, scalar_prefetch = 0 : i64, scratch_operands = 0 : i64, tpu.core_type = #tpu.core_type<tc>, window_params = [{transform_indices = @transform_0, window_bounds = array<i64: 512, 256>}, {transform_indices = @transform_1, window_bounds = array<i64: 256, 128>}, {transform_indices = @transform_2, window_bounds = array<i64: 1, 128>}, {transform_indices = @transform_3, window_bounds = array<i64: 512, 128>}]} {
    %c0 = arith.constant 0 : index
    %c0_0 = arith.constant 0 : index
    %0 = vector.load %arg2[%c0, %c0_0] : memref<512x256xbf16, #tpu.memory_space<vmem>>, vector<512x256xbf16>
    %c0_1 = arith.constant 0 : index
    %c0_2 = arith.constant 0 : index
    %1 = vector.load %arg3[%c0_1, %c0_2] : memref<256x128xbf16, #tpu.memory_space<vmem>>, vector<256x128xbf16>
    %cst = arith.constant dense<0.000000e+00> : vector<512x128xf32>
    %2 = tpu.matmul %0, %1, %cst {dimension_numbers = #tpu.dot_dimension_numbers<[1], [0], [0], [1], [0, 0, 1, 1], [], []>} : vector<512x256xbf16>, vector<256x128xbf16>, vector<512x128xf32> -> vector<512x128xf32>
    %c0_3 = arith.constant 0 : index
    %c0_4 = arith.constant 0 : index
    %3 = vector.load %arg4[%c0_3, %c0_4] : memref<1x128xf32, #tpu.memory_space<vmem>>, vector<1x128xf32>
    %4 = vector.broadcast %3 : vector<1x128xf32> to vector<512x128xf32>
    %5 = arith.addf %2, %4 : vector<512x128xf32>
    %c0_5 = arith.constant 0 : index
    %c0_6 = arith.constant 0 : index
    %6 = vector.load %arg5[%c0_5, %c0_6] : memref<512x128xf32, #tpu.memory_space<vmem>>, vector<512x128xf32>
    tpu.vector_store %arg5[%c0_5, %c0_6], %5 {strides = array<i32>} : memref<512x128xf32, #tpu.memory_space<vmem>>, vector<512x128xf32>,
    return
  }
  func.func @transform_0(%arg0: i32, %arg1: i32) -> (i32, i32) {
    %c0_i32 = arith.constant 0 : i32
    %c0_i32_0 = arith.constant 0 : i32
    return %arg0, %c0_i32 : i32, i32
  }
  func.func @transform_1(%arg0: i32, %arg1: i32) -> (i32, i32) {
    %c0_i32 = arith.constant 0 : i32
    %c0_i32_0 = arith.constant 0 : i32
    return %c0_i32, %arg1 : i32, i32
  }
  func.func @transform_2(%arg0: i32, %arg1: i32) -> (i32, i32) {
    %c0_i32 = arith.constant 0 : i32
    %c0_i32_0 = arith.constant 0 : i32
    return %c0_i32, %arg1 : i32, i32
  }
  func.func @transform_3(%arg0: i32, %arg1: i32) -> (i32, i32) {
    %c0_i32 = arith.constant 0 : i32
    return %arg0, %arg1 : i32, i32
  }
}

</mosaic_0001>

<bundles_post_ra>
// kernel: tpu_custom_call.1
= control target key start
LH: loop header
LB: loop body
LE: loop exit
PB: predicated region body
PF: predicated region fallthrough
CT: control target
= control target key end

     0   :  { %8 = vsyncpa [#allocation3], 0  ;;  %s1410_s0 = inlined_call_operand.hbm [shape: bf16[512,256], index: 0, kind: input, shape index: {}]   ;;  %s1411_s1 = inlined_call_operand.hbm [shape: bf16[256,128], index: 1, kind: input, shape index: {}]   ;;  %s1412_s2 = inlined_call_operand.vmem [shape: f32[1,128], index: 2, kind: input, shape index: {}]   ;;  %s1413_s3 = inlined_call_operand.hbm [shape: f32[512,128], index: 3, kind: output, shape index: {}]  }
   0x1   :  { %9 = vsyncpa [#allocation6], 0 }
   0x2   :  { %10 = vsyncpa [#allocation4], 0  ;;  %s1239_s12 = smov [#allocation2]   ;;  %s1167_s16 = scalar_lea.hbm %s1410_s0, 8192 }
   0x3   :  { %s16_s13 = sshll.u32 %s1239_s12, 4  ;;  %p1168_p0 = scmp.ne.s32.totalorder %s1410_s0, %s1167_s16  ;;  %s17_s13 = int_to_ptr.vmem [resolvable:$true] %s16_s13 }
   0x4   :  { %p1171_p1 = scmp.lt.u32.totalorder %s1167_s16, %s1410_s0 }
   0x6   :  { %p1173_p2 = pnand %p1171_p1, %p1168_p0 }
   0x8   :  { %1176 = shalt.err (!%p1173_p2)
}
   0x9   :  { %s1177_s21 = scalar_lea.vmem %s17_s13, 8192  ;;  %p1182_p4 = scmp.lt.s32.totalorder %s17_s13, %s17_s13 }
   0xa   :  { %p1178_p3 = scmp.ne.s32.totalorder %s17_s13, %s1177_s21  ;;  %p1183_p5 = scmp.lt.s32.totalorder %s1177_s21, %s1177_s21 }
   0xc   :  { %p1184_p6 = por %p1183_p5, %p1182_p4 }
   0xe   :  { %p1185_p7 = pnand %p1184_p6, %p1178_p3 }
  0x10   :  { %1188 = shalt.err (!%p1185_p7)
}
  0x11   :  { %s1240_s22 = smov 128   ;;  %s1241_s23 = smov 8  }
  0x12   :  { %22 = dma.hbm_to_vmem [thread:$0]  %s1410_s0, 8192, %s17_s13, [#allocation3], %s1240_s22, %s1240_s22, %s1241_s23  }
  0x13   :  { %s1242_s26 = smov [#allocation5]   ;;  %s1189_s30 = scalar_lea.hbm %s1411_s1, 2048 }
  0x14   :  { %s28_s27 = sshll.u32 %s1242_s26, 4  ;;  %p1190_p8 = scmp.ne.s32.totalorder %s1411_s1, %s1189_s30  ;;  %s29_s27 = int_to_ptr.vmem [resolvable:$true] %s28_s27 }
  0x15   :  { %p1193_p9 = scmp.lt.u32.totalorder %s1189_s30, %s1411_s1 }
  0x17   :  { %p1195_p10 = pnand %p1193_p9, %p1190_p8 }
  0x19   :  { %1198 = shalt.err (!%p1195_p10)
}
  0x1a   :  { %s1199_s8 = scalar_lea.vmem %s29_s27, 2048  ;;  %p1204_p12 = scmp.lt.s32.totalorder %s29_s27, %s29_s27 }
  0x1b   :  { %p1200_p11 = scmp.ne.s32.totalorder %s29_s27, %s1199_s8  ;;  %p1205_p13 = scmp.lt.s32.totalorder %s1199_s8, %s1199_s8 }
  0x1d   :  { %p1206_p0 = por %p1205_p13, %p1204_p12 }
  0x1f   :  { %p1207_p1 = pnand %p1206_p0, %p1200_p11 }
  0x21   :  { %1210 = shalt.err (!%p1207_p1)
}
  0x22   :  { %s1243_s0 = smov 64   ;;  %s1244_s9 = smov 4  }
  0x23   :  { %34 = dma.hbm_to_vmem [thread:$0]  %s1411_s1, 2048, %s29_s27, [#allocation6], %s1243_s0, %s1243_s0, %s1244_s9  }
  0x24   :  { %1233 = dma.done.wait [#allocation3], 8192  }
  0x25   :  { %1234 = vsyncadd [#allocation3], 4294959104 }
  0x26   :  { %1235 = dma.done.wait [#allocation6], 2048  }
  0x27   :  { %1236 = vsyncadd [#allocation6], 4294965248  ;;  %v1245_v0 = vmov 0   ;;  %v1055_v1 = vld [vmem:[#allocation5] sm:$0xff]   ;;  %v1056_v2 = vld [vmem:[#allocation5 + $0x8] sm:$0xff]  }
  0x28   :  { %563 = vmatprep.subr.bf16.mxu0 %v1245_v0  ;;  %1015 = vmatprep.subr.bf16.mxu1 %v1245_v0  ;;  %v1057_v3 = vld [vmem:[#allocation5 + $0x10] sm:$0xff]   ;;  %v1058_v4 = vld [vmem:[#allocation5 + $0x18] sm:$0xff]   ;;  %v1059_v5 = vld [vmem:[#allocation5 + $0x20] sm:$0xff]  }
  0x29   :  { %564 = vmatpush1.bf16.msra.mxu0 %v1055_v1  ;;  %1031 = vmatpush1.bf16.msra.mxu1 %v1055_v1  ;;  %v1073_v6 = vld [vmem:[#allocation2 + $0x4] ss:$8 sps:$4 sm:$0xff]   ;;  %v1061_v9 = vld [vmem:[#allocation5 + $0x30] sm:$0xff]   ;;  %v1062_v10 = vld [vmem:[#allocation5 + $0x38] sm:$0xff]  }
  0x2a   :  { %565 = vmatprep.subr.bf16.mxu0 %v1245_v0  ;;  %1016 = vmatprep.subr.bf16.mxu1 %v1245_v0  ;;  %v1060_v7 = vld [vmem:[#allocation5 + $0x28] sm:$0xff]   ;;  %v1063_v11 = vld [vmem:[#allocation5 + $0x40] sm:$0xff]   ;;  %v1065_v13 = vld [vmem:[#allocation5 + $0x50] sm:$0xff]  }
  0x2b   :  { %v1076_v8 = vld [vmem:[#allocation2 + $0x104] ss:$8 sps:$4 sm:$0xff]   ;;  %595 = vmatprep.mubr.bf16.mxu0 %v1073_v6  ;;  %v1066_v14 = vld [vmem:[#allocation5 + $0x58] sm:$0xff]   ;;  %v1069_v17 = vld [vmem:[#allocation5 + $0x70] sm:$0xff]  }
  0x2c   :  { %723 = vmatprep.mubr.bf16.mxu1 %v1076_v8  ;;  %v1064_v12 = vld [vmem:[#allocation5 + $0x48] sm:$0xff]   ;;  %v1067_v15 = vld [vmem:[#allocation5 + $0x60] sm:$0xff]   ;;  %v1070_v18 = vld [vmem:[#allocation5 + $0x78] sm:$0xff]  }
  0x2d   :  { %566 = vmatpush1.bf16.msra.mxu0 %v1056_v2  ;;  %1032 = vmatpush1.bf16.msra.mxu1 %v1056_v2  ;;  %v1068_v16 = vld [vmem:[#allocation5 + $0x68] sm:$0xff]   ;;  %v1077_v21 = vld [vmem:[#allocation2 + $0x14] ss:$8 sps:$4 sm:$0xff]   ;;  %v1081_v23 = vld [vmem:[#allocation2 + $0x10] ss:$8 sps:$4 sm:$0xff]  }
  0x2e   :  { %567 = vmatprep.subr.bf16.mxu0 %v1245_v0  ;;  %1017 = vmatprep.subr.bf16.mxu1 %v1245_v0  ;;  %v1071_v19 = vld [vmem:[#allocation2] ss:$8 sps:$4 sm:$0xff]   ;;  %v1079_v22 = vld [vmem:[#allocation2 + $0x114] ss:$8 sps:$4 sm:$0xff]   ;;  %v1082_v24 = vld [vmem:[#allocation2 + $0x110] ss:$8 sps:$4 sm:$0xff]  }
  0x2f   :  { %v1074_v20 = vld [vmem:[#allocation2 + $0x100] ss:$8 sps:$4 sm:$0xff]   ;;  %v1083_v25 = vld [vmem:[#allocation2 + $0x24] ss:$8 sps:$4 sm:$0xff]   ;;  %v1089_v29 = vld [vmem:[#allocation2 + $0x34] ss:$8 sps:$4 sm:$0xff]  }
  0x30   :  { %v1085_v26 = vld [vmem:[#allocation2 + $0x124] ss:$8 sps:$4 sm:$0xff]   ;;  %v1087_v27 = vld [vmem:[#allocation2 + $0x20] ss:$8 sps:$4 sm:$0xff]   ;;  %v1091_v30 = vld [vmem:[#allocation2 + $0x134] ss:$8 sps:$4 sm:$0xff]  }
  0x31   :  { %568 = vmatpush1.bf16.msra.mxu0 %v1057_v3  ;;  %1033 = vmatpush1.bf16.msra.mxu1 %v1057_v3  ;;  %v1088_v28 = vld [vmem:[#allocation2 + $0x120] ss:$8 sps:$4 sm:$0xff]   ;;  %v1093_v31 = vld [vmem:[#allocation2 + $0x30] ss:$8 sps:$4 sm:$0xff]   ;;  %v1095_v33 = vld [vmem:[#allocation2 + $0x44] ss:$8 sps:$4 sm:$0xff]  }
  0x32   :  { %569 = vmatprep.subr.bf16.mxu0 %v1245_v0  ;;  %1018 = vmatprep.subr.bf16.mxu1 %v1245_v0  ;;  %v1094_v32 = vld [vmem:[#allocation2 + $0x130] ss:$8 sps:$4 sm:$0xff]   ;;  %v1097_v34 = vld [vmem:[#allocation2 + $0x144] ss:$8 sps:$4 sm:$0xff]   ;;  %v1099_v35 = vld [vmem:[#allocation2 + $0x40] ss:$8 sps:$4 sm:$0xff]  }
  0x33   :  { %v1100_v36 = vld [vmem:[#allocation2 + $0x140] ss:$8 sps:$4 sm:$0xff]   ;;  %v1101_v37 = vld [vmem:[#allocation2 + $0x54] ss:$8 sps:$4 sm:$0xff]   ;;  %v1105_v39 = vld [vmem:[#allocation2 + $0x50] ss:$8 sps:$4 sm:$0xff]  }
  0x34   :  { %v1103_v38 = vld [vmem:[#allocation2 + $0x154] ss:$8 sps:$4 sm:$0xff]   ;;  %v1106_v40 = vld [vmem:[#allocation2 + $0x150] ss:$8 sps:$4 sm:$0xff]   ;;  %v1107_v41 = vld [vmem:[#allocation2 + $0x64] ss:$8 sps:$4 sm:$0xff]  }
  0x35   :  { %570 = vmatpush1.bf16.msra.mxu0 %v1058_v4  ;;  %1034 = vmatpush1.bf16.msra.mxu1 %v1058_v4  ;;  %v1109_v42 = vld [vmem:[#allocation2 + $0x164] ss:$8 sps:$4 sm:$0xff]   ;;  %v1111_v43 = vld [vmem:[#allocation2 + $0x60] ss:$8 sps:$4 sm:$0xff]   ;;  %v1113_v45 = vld [vmem:[#allocation2 + $0x74] ss:$8 sps:$4 sm:$0xff]  }
  0x36   :  { %571 = vmatprep.subr.bf16.mxu0 %v1245_v0  ;;  %1019 = vmatprep.subr.bf16.mxu1 %v1245_v0  ;;  %v1112_v44 = vld [vmem:[#allocation2 + $0x160] ss:$8 sps:$4 sm:$0xff]   ;;  %v1115_v46 = vld [vmem:[#allocation2 + $0x174] ss:$8 sps:$4 sm:$0xff]   ;;  %v1117_v47 = vld [vmem:[#allocation2 + $0x70] ss:$8 sps:$4 sm:$0xff]  }
  0x37   :  { %v1118_v48 = vld [vmem:[#allocation2 + $0x170] ss:$8 sps:$4 sm:$0xff]   ;;  %v1119_v49 = vld [vmem:[#allocation2 + $0x84] ss:$8 sps:$4 sm:$0xff]   ;;  %v1123_v51 = vld [vmem:[#allocation2 + $0x80] ss:$8 sps:$4 sm:$0xff]  }
  0x38   :  { %v1121_v50 = vld [vmem:[#allocation2 + $0x184] ss:$8 sps:$4 sm:$0xff]   ;;  %v1124_v52 = vld [vmem:[#allocation2 + $0x180] ss:$8 sps:$4 sm:$0xff]   ;;  %v1125_v53 = vld [vmem:[#allocation2 + $0x94] ss:$8 sps:$4 sm:$0xff]  }
  0x39   :  { %572 = vmatpush1.bf16.msra.mxu0 %v1059_v5  ;;  %1035 = vmatpush1.bf16.msra.mxu1 %v1059_v5  ;;  %v1127_v54 = vld [vmem:[#allocation2 + $0x194] ss:$8 sps:$4 sm:$0xff]   ;;  %v1129_v55 = vld [vmem:[#allocation2 + $0x90] ss:$8 sps:$4 sm:$0xff]   ;;  %v1131_v57 = vld [vmem:[#allocation2 + $0xa4] ss:$8 sps:$4 sm:$0xff]  }
  0x3a   :  { %573 = vmatprep.subr.bf16.mxu0 %v1245_v0  ;;  %1020 = vmatprep.subr.bf16.mxu1 %v1245_v0  ;;  %v1130_v56 = vld [vmem:[#allocation2 + $0x190] ss:$8 sps:$4 sm:$0xff]   ;;  %v1133_v58 = vld [vmem:[#allocation2 + $0x1a4] ss:$8 sps:$4 sm:$0xff]   ;;  %v1135_v59 = vld [vmem:[#allocation2 + $0xa0] ss:$8 sps:$4 sm:$0xff]  }
  0x3b   :  { %v1136_v60 = vld [vmem:[#allocation2 + $0x1a0] ss:$8 sps:$4 sm:$0xff]   ;;  %v1137_v61 = vld [vmem:[#allocation2 + $0xb4] ss:$8 sps:$4 sm:$0xff]   ;;  %v1141_v63 = vld [vmem:[#allocation2 + $0xb0] ss:$8 sps:$4 sm:$0xff]  }
  0x3c   :  { %v1139_v62 = vld [vmem:[#allocation2 + $0x1b4] ss:$8 sps:$4 sm:$0xff]   ;;  %v1143_v1 = vld [vmem:[#allocation2 + $0xc4] ss:$8 sps:$4 sm:$0xff]   ;;  %v1147_v3 = vld [vmem:[#allocation2 + $0xc0] ss:$8 sps:$4 sm:$0xff]  }
  0x3d   :  { %574 = vmatpush1.bf16.msra.mxu0 %v1060_v7  ;;  %1036 = vmatpush1.bf16.msra.mxu1 %v1060_v7  ;;  %v1145_v2 = vld [vmem:[#allocation2 + $0x1c4] ss:$8 sps:$4 sm:$0xff]   ;;  %v1148_v4 = vld [vmem:[#allocation2 + $0x1c0] ss:$8 sps:$4 sm:$0xff]   ;;  %v1149_v5 = vld [vmem:[#allocation2 + $0xd4] ss:$8 sps:$4 sm:$0xff]  }
  0x3e   :  { %575 = vmatprep.subr.bf16.mxu0 %v1245_v0  ;;  %1021 = vmatprep.subr.bf16.mxu1 %v1245_v0  ;;  %v1151_v6 = vld [vmem:[#allocation2 + $0x1d4] ss:$8 sps:$4 sm:$0xff]   ;;  %v1153_v7 = vld [vmem:[#allocation2 + $0xd0] ss:$8 sps:$4 sm:$0xff]  }
  0x3f   :  { %v1154_v8 = vld [vmem:[#allocation2 + $0x1d0] ss:$8 sps:$4 sm:$0xff]  }
  0x41   :  { %576 = vmatpush1.bf16.msra.mxu0 %v1061_v9  ;;  %1037 = vmatpush1.bf16.msra.mxu1 %v1061_v9  ;;  %v1155_v9 = vld [vmem:[#allocation2 + $0xe4] ss:$8 sps:$4 sm:$0xff]  }
  0x42   :  { %577 = vmatprep.subr.bf16.mxu0 %v1245_v0  ;;  %1022 = vmatprep.subr.bf16.mxu1 %v1245_v0 }
  0x45   :  { %578 = vmatpush1.bf16.msra.mxu0 %v1062_v10  ;;  %1038 = vmatpush1.bf16.msra.mxu1 %v1062_v10  ;;  %v1157_v10 = vld [vmem:[#allocation2 + $0x1e4] ss:$8 sps:$4 sm:$0xff]  }
  0x46   :  { %579 = vmatprep.subr.bf16.mxu0 %v1245_v0  ;;  %1023 = vmatprep.subr.bf16.mxu1 %v1245_v0 }
  0x49   :  { %580 = vmatpush1.bf16.msra.mxu0 %v1063_v11  ;;  %1039 = vmatpush1.bf16.msra.mxu1 %v1063_v11  ;;  %v1159_v11 = vld [vmem:[#allocation2 + $0xe0] ss:$8 sps:$4 sm:$0xff]  }
  0x4a   :  { %581 = vmatprep.subr.bf16.mxu0 %v1245_v0  ;;  %1024 = vmatprep.subr.bf16.mxu1 %v1245_v0 }
  0x4d   :  { %582 = vmatpush1.bf16.msra.mxu0 %v1064_v12  ;;  %1040 = vmatpush1.bf16.msra.mxu1 %v1064_v12  ;;  %v1160_v12 = vld [vmem:[#allocation2 + $0x1e0] ss:$8 sps:$4 sm:$0xff]  }
  0x4e   :  { %583 = vmatprep.subr.bf16.mxu0 %v1245_v0  ;;  %1025 = vmatprep.subr.bf16.mxu1 %v1245_v0 }
  0x51   :  { %584 = vmatpush1.bf16.msra.mxu0 %v1065_v13  ;;  %1041 = vmatpush1.bf16.msra.mxu1 %v1065_v13  ;;  %v1161_v13 = vld [vmem:[#allocation2 + $0xf4] ss:$8 sps:$4 sm:$0xff]  }
  0x52   :  { %585 = vmatprep.subr.bf16.mxu0 %v1245_v0  ;;  %1026 = vmatprep.subr.bf16.mxu1 %v1245_v0 }
  0x55   :  { %586 = vmatpush1.bf16.msra.mxu0 %v1066_v14  ;;  %1042 = vmatpush1.bf16.msra.mxu1 %v1066_v14  ;;  %v1163_v14 = vld [vmem:[#allocation2 + $0x1f4] ss:$8 sps:$4 sm:$0xff]  }
  0x56   :  { %587 = vmatprep.subr.bf16.mxu0 %v1245_v0  ;;  %1027 = vmatprep.subr.bf16.mxu1 %v1245_v0 }
  0x59   :  { %588 = vmatpush1.bf16.msra.mxu0 %v1067_v15  ;;  %1043 = vmatpush1.bf16.msra.mxu1 %v1067_v15  ;;  %v1165_v15 = vld [vmem:[#allocation2 + $0xf0] ss:$8 sps:$4 sm:$0xff]  }
  0x5a   :  { %589 = vmatprep.subr.bf16.mxu0 %v1245_v0  ;;  %1028 = vmatprep.subr.bf16.mxu1 %v1245_v0 }
  0x5d   :  { %590 = vmatpush1.bf16.msra.mxu0 %v1068_v16  ;;  %1044 = vmatpush1.bf16.msra.mxu1 %v1068_v16  ;;  %v1166_v16 = vld [vmem:[#allocation2 + $0x1f0] ss:$8 sps:$4 sm:$0xff]  }
  0x5e   :  { %591 = vmatprep.subr.bf16.mxu0 %v1245_v0  ;;  %1029 = vmatprep.subr.bf16.mxu1 %v1245_v0 }
  0x61   :  { %592 = vmatpush1.bf16.msra.mxu0 %v1069_v17  ;;  %1045 = vmatpush1.bf16.msra.mxu1 %v1069_v17  ;;  %v1329_v17 = vld [vmem:[%s1412_s2] ss:$0 sm:$0xff]  ;;  %s1246_s2 = smov [#allocation7]  }
  0x62   :  { %593 = vmatprep.subr.bf16.mxu0 %v1245_v0  ;;  %1030 = vmatprep.subr.bf16.mxu1 %v1245_v0  ;;  %v1142_v0 = vld [vmem:[#allocation2 + $0x1b0] ss:$8 sps:$4 sm:$0xff]   ;;  %s921_s13 = sshll.u32 %s1246_s2, 4  ;;  %s922_s13 = int_to_ptr.vmem [resolvable:$true] %s921_s13 }
  0x63   :  { %s1211_s14 = scalar_lea.vmem %s922_s13, 8192  ;;  %p1216_p3 = scmp.lt.s32.totalorder %s922_s13, %s922_s13 }
  0x64   :  { %p1212_p2 = scmp.ne.s32.totalorder %s922_s13, %s1211_s14  ;;  %p1217_p4 = scmp.lt.s32.totalorder %s1211_s14, %s1211_s14 }
  0x65   :  { %594 = vmatpush1.bf16.msra.mxu0 %v1070_v18  ;;  %1046 = vmatpush1.bf16.msra.mxu1 %v1070_v18 }
  0x66   :  { %p1218_p5 = por %p1217_p4, %p1216_p3 }
  0x68   :  { %596 = vmatmul.mubr.bf16.vlgmr.msra.gmra.mrb[0].mxu0 %v1071_v19  ;;  %724 = vmatmul.mubr.bf16.vlgmr.msra.gmra.mrb[0].mxu1 %v1074_v20  ;;  %p1219_p6 = pnand %p1218_p5, %p1212_p2 }
  0x69   :  { %603 = vmatprep.mubr.bf16.mxu0 %v1077_v21  ;;  %731 = vmatprep.mubr.bf16.mxu1 %v1079_v22 }
  0x70   :  { %604 = vmatmul.mubr.bf16.gmra.mrb[4].mxu0 %v1081_v23  ;;  %732 = vmatmul.mubr.bf16.gmra.mrb[4].mxu1 %v1082_v24 }
  0x71   :  { %611 = vmatprep.mubr.bf16.mxu0 %v1083_v25  ;;  %739 = vmatprep.mubr.bf16.mxu1 %v1085_v26 }
  0x78   :  { %612 = vmatmul.mubr.bf16.gmra.mrb[8].mxu0 %v1087_v27  ;;  %740 = vmatmul.mubr.bf16.gmra.mrb[8].mxu1 %v1088_v28 }
  0x79   :  { %619 = vmatprep.mubr.bf16.mxu0 %v1089_v29  ;;  %747 = vmatprep.mubr.bf16.mxu1 %v1091_v30 }
  0x80   :  { %620 = vmatmul.mubr.bf16.gmra.mrb[12].mxu0 %v1093_v31  ;;  %748 = vmatmul.mubr.bf16.gmra.mrb[12].mxu1 %v1094_v32 }
  0x81   :  { %627 = vmatprep.mubr.bf16.mxu0 %v1095_v33  ;;  %755 = vmatprep.mubr.bf16.mxu1 %v1097_v34 }
  0x88   :  { %628 = vmatmul.mubr.bf16.gmra.mrb[16].mxu0 %v1099_v35  ;;  %756 = vmatmul.mubr.bf16.gmra.mrb[16].mxu1 %v1100_v36 }
  0x89   :  { %635 = vmatprep.mubr.bf16.mxu0 %v1101_v37  ;;  %763 = vmatprep.mubr.bf16.mxu1 %v1103_v38 }
  0x90   :  { %636 = vmatmul.mubr.bf16.gmra.mrb[20].mxu0 %v1105_v39  ;;  %764 = vmatmul.mubr.bf16.gmra.mrb[20].mxu1 %v1106_v40 }
  0x91   :  { %643 = vmatprep.mubr.bf16.mxu0 %v1107_v41  ;;  %771 = vmatprep.mubr.bf16.mxu1 %v1109_v42 }
  0x98   :  { %644 = vmatmul.mubr.bf16.gmra.mrb[24].mxu0 %v1111_v43  ;;  %772 = vmatmul.mubr.bf16.gmra.mrb[24].mxu1 %v1112_v44 }
  0x99   :  { %651 = vmatprep.mubr.bf16.mxu0 %v1113_v45  ;;  %779 = vmatprep.mubr.bf16.mxu1 %v1115_v46 }
  0xa0   :  { %652 = vmatmul.mubr.bf16.gmra.mrb[28].mxu0 %v1117_v47  ;;  %780 = vmatmul.mubr.bf16.gmra.mrb[28].mxu1 %v1118_v48 }
  0xa1   :  { %659 = vmatprep.mubr.bf16.mxu0 %v1119_v49  ;;  %787 = vmatprep.mubr.bf16.mxu1 %v1121_v50 }
  0xa8   :  { %660 = vmatmul.mubr.bf16.gmra.mrb[32].mxu0 %v1123_v51  ;;  %788 = vmatmul.mubr.bf16.gmra.mrb[32].mxu1 %v1124_v52 }
  0xa9   :  { %667 = vmatprep.mubr.bf16.mxu0 %v1125_v53  ;;  %795 = vmatprep.mubr.bf16.mxu1 %v1127_v54 }
  0xb0   :  { %668 = vmatmul.mubr.bf16.gmra.mrb[36].mxu0 %v1129_v55  ;;  %796 = vmatmul.mubr.bf16.gmra.mrb[36].mxu1 %v1130_v56 }
  0xb1   :  { %675 = vmatprep.mubr.bf16.mxu0 %v1131_v57  ;;  %803 = vmatprep.mubr.bf16.mxu1 %v1133_v58 }
  0xb8   :  { %676 = vmatmul.mubr.bf16.gmra.mrb[40].mxu0 %v1135_v59  ;;  %804 = vmatmul.mubr.bf16.gmra.mrb[40].mxu1 %v1136_v60 }
  0xb9   :  { %683 = vmatprep.mubr.bf16.mxu0 %v1137_v61  ;;  %811 = vmatprep.mubr.bf16.mxu1 %v1139_v62 }
  0xc0   :  { %684 = vmatmul.mubr.bf16.gmra.mrb[44].mxu0 %v1141_v63  ;;  %812 = vmatmul.mubr.bf16.gmra.mrb[44].mxu1 %v1142_v0 }
  0xc1   :  { %691 = vmatprep.mubr.bf16.mxu0 %v1143_v1  ;;  %819 = vmatprep.mubr.bf16.mxu1 %v1145_v2 }
  0xc8   :  { %692 = vmatmul.mubr.bf16.gmra.mrb[48].mxu0 %v1147_v3  ;;  %820 = vmatmul.mubr.bf16.gmra.mrb[48].mxu1 %v1148_v4 }
  0xc9   :  { %699 = vmatprep.mubr.bf16.mxu0 %v1149_v5  ;;  %827 = vmatprep.mubr.bf16.mxu1 %v1151_v6 }
  0xd0   :  { %700 = vmatmul.mubr.bf16.gmra.mrb[52].mxu0 %v1153_v7  ;;  %828 = vmatmul.mubr.bf16.gmra.mrb[52].mxu1 %v1154_v8 }
  0xd1   :  { %707 = vmatprep.mubr.bf16.mxu0 %v1155_v9  ;;  %835 = vmatprep.mubr.bf16.mxu1 %v1157_v10 }
  0xd8   :  { %708 = vmatmul.mubr.bf16.gmra.mrb[56].mxu0 %v1159_v11  ;;  %836 = vmatmul.mubr.bf16.gmra.mrb[56].mxu1 %v1160_v12 }
  0xd9   :  { %715 = vmatprep.mubr.bf16.mxu0 %v1161_v13  ;;  %843 = vmatprep.mubr.bf16.mxu1 %v1163_v14 }
  0xe0   :  { %716 = vmatmul.mubr.bf16.gmra.mrb[60].mxu0 %v1165_v15  ;;  %844 = vmatmul.mubr.bf16.gmra.mrb[60].mxu1 %v1166_v16 }
 0x13b   :  { %v597_v18 = vpop.f32.mrb[0].mxu0  ;;  %v725_v19 = vpop.f32.mrb[0].mxu1 }
 0x13c   :  { %v598_v20 = vadd.f32 %v1329_v17, %v597_v18  ;;  %v726_v21 = vadd.f32 %v1329_v17, %v725_v19  ;;  %v599_v22 = vpop.f32.mrb[1].mxu0  ;;  %v727_v23 = vpop.f32.mrb[1].mxu1 }
 0x13d   :  { %v600_v24 = vpop.f32.mrb[2].mxu0  ;;  %v728_v25 = vpop.f32.mrb[2].mxu1 }
 0x13e   :  { %852 = vst [vmem:[#allocation7] sm:$0xff] %v598_v20  ;;  %884 = vst [vmem:[#allocation7 + $0x100] sm:$0xff] %v726_v21  ;;  %v601_v26 = vadd.f32 %v1329_v17, %v600_v24  ;;  %v729_v27 = vadd.f32 %v1329_v17, %v728_v25  ;;  %v602_v28 = vpop.f32.mrb[3].mxu0  ;;  %v730_v29 = vpop.f32.mrb[3].mxu1 }
 0x140   :  { %853 = vst [vmem:[#allocation7 + $0x8] sm:$0xff] %v601_v26  ;;  %885 = vst [vmem:[#allocation7 + $0x108] sm:$0xff] %v729_v27 }
 0x143   :  { %v605_v30 = vpop.f32.mrb[4].mxu0  ;;  %v733_v31 = vpop.f32.mrb[4].mxu1 }
 0x144   :  { %v606_v32 = vadd.f32 %v1329_v17, %v605_v30  ;;  %v734_v33 = vadd.f32 %v1329_v17, %v733_v31  ;;  %v607_v34 = vpop.f32.mrb[5].mxu0  ;;  %v735_v35 = vpop.f32.mrb[5].mxu1 }
 0x145   :  { %v608_v36 = vpop.f32.mrb[6].mxu0  ;;  %v736_v37 = vpop.f32.mrb[6].mxu1 }
 0x146   :  { %854 = vst [vmem:[#allocation7 + $0x10] sm:$0xff] %v606_v32  ;;  %886 = vst [vmem:[#allocation7 + $0x110] sm:$0xff] %v734_v33  ;;  %v609_v38 = vadd.f32 %v1329_v17, %v608_v36  ;;  %v737_v39 = vadd.f32 %v1329_v17, %v736_v37  ;;  %v610_v40 = vpop.f32.mrb[7].mxu0  ;;  %v738_v41 = vpop.f32.mrb[7].mxu1 }
 0x148   :  { %855 = vst [vmem:[#allocation7 + $0x18] sm:$0xff] %v609_v38  ;;  %887 = vst [vmem:[#allocation7 + $0x118] sm:$0xff] %v737_v39 }
 0x14b   :  { %v613_v42 = vpop.f32.mrb[8].mxu0  ;;  %v741_v43 = vpop.f32.mrb[8].mxu1 }
 0x14c   :  { %v614_v44 = vadd.f32 %v1329_v17, %v613_v42  ;;  %v742_v45 = vadd.f32 %v1329_v17, %v741_v43  ;;  %v615_v46 = vpop.f32.mrb[9].mxu0  ;;  %v743_v47 = vpop.f32.mrb[9].mxu1 }
 0x14d   :  { %v616_v48 = vpop.f32.mrb[10].mxu0  ;;  %v744_v49 = vpop.f32.mrb[10].mxu1 }
 0x14e   :  { %856 = vst [vmem:[#allocation7 + $0x20] sm:$0xff] %v614_v44  ;;  %888 = vst [vmem:[#allocation7 + $0x120] sm:$0xff] %v742_v45  ;;  %v617_v50 = vadd.f32 %v1329_v17, %v616_v48  ;;  %v745_v51 = vadd.f32 %v1329_v17, %v744_v49  ;;  %v618_v52 = vpop.f32.mrb[11].mxu0  ;;  %v746_v53 = vpop.f32.mrb[11].mxu1 }
 0x150   :  { %857 = vst [vmem:[#allocation7 + $0x28] sm:$0xff] %v617_v50  ;;  %889 = vst [vmem:[#allocation7 + $0x128] sm:$0xff] %v745_v51 }
 0x153   :  { %v621_v54 = vpop.f32.mrb[12].mxu0  ;;  %v749_v55 = vpop.f32.mrb[12].mxu1 }
 0x154   :  { %v622_v56 = vadd.f32 %v1329_v17, %v621_v54  ;;  %v750_v57 = vadd.f32 %v1329_v17, %v749_v55  ;;  %v623_v58 = vpop.f32.mrb[13].mxu0  ;;  %v751_v59 = vpop.f32.mrb[13].mxu1 }
 0x155   :  { %v624_v60 = vpop.f32.mrb[14].mxu0  ;;  %v752_v61 = vpop.f32.mrb[14].mxu1 }
 0x156   :  { %858 = vst [vmem:[#allocation7 + $0x30] sm:$0xff] %v622_v56  ;;  %890 = vst [vmem:[#allocation7 + $0x130] sm:$0xff] %v750_v57  ;;  %v625_v62 = vadd.f32 %v1329_v17, %v624_v60  ;;  %v753_v63 = vadd.f32 %v1329_v17, %v752_v61  ;;  %v626_v0 = vpop.f32.mrb[15].mxu0  ;;  %v754_v1 = vpop.f32.mrb[15].mxu1 }
 0x158   :  { %859 = vst [vmem:[#allocation7 + $0x38] sm:$0xff] %v625_v62  ;;  %891 = vst [vmem:[#allocation7 + $0x138] sm:$0xff] %v753_v63 }
 0x15b   :  { %v629_v2 = vpop.f32.mrb[16].mxu0  ;;  %v757_v3 = vpop.f32.mrb[16].mxu1 }
 0x15c   :  { %v630_v4 = vadd.f32 %v1329_v17, %v629_v2  ;;  %v758_v5 = vadd.f32 %v1329_v17, %v757_v3  ;;  %v631_v6 = vpop.f32.mrb[17].mxu0  ;;  %v759_v7 = vpop.f32.mrb[17].mxu1 }
 0x15d   :  { %v632_v8 = vpop.f32.mrb[18].mxu0  ;;  %v760_v9 = vpop.f32.mrb[18].mxu1 }
 0x15e   :  { %860 = vst [vmem:[#allocation7 + $0x40] sm:$0xff] %v630_v4  ;;  %892 = vst [vmem:[#allocation7 + $0x140] sm:$0xff] %v758_v5  ;;  %v633_v10 = vadd.f32 %v1329_v17, %v632_v8  ;;  %v761_v11 = vadd.f32 %v1329_v17, %v760_v9  ;;  %v634_v12 = vpop.f32.mrb[19].mxu0  ;;  %v762_v13 = vpop.f32.mrb[19].mxu1 }
 0x160   :  { %861 = vst [vmem:[#allocation7 + $0x48] sm:$0xff] %v633_v10  ;;  %893 = vst [vmem:[#allocation7 + $0x148] sm:$0xff] %v761_v11 }
 0x163   :  { %v637_v14 = vpop.f32.mrb[20].mxu0  ;;  %v765_v15 = vpop.f32.mrb[20].mxu1 }
 0x164   :  { %v638_v16 = vadd.f32 %v1329_v17, %v637_v14  ;;  %v766_v18 = vadd.f32 %v1329_v17, %v765_v15  ;;  %v639_v19 = vpop.f32.mrb[21].mxu0  ;;  %v767_v20 = vpop.f32.mrb[21].mxu1 }
 0x165   :  { %v640_v21 = vpop.f32.mrb[22].mxu0  ;;  %v768_v22 = vpop.f32.mrb[22].mxu1 }
 0x166   :  { %862 = vst [vmem:[#allocation7 + $0x50] sm:$0xff] %v638_v16  ;;  %894 = vst [vmem:[#allocation7 + $0x150] sm:$0xff] %v766_v18  ;;  %v641_v23 = vadd.f32 %v1329_v17, %v640_v21  ;;  %v769_v24 = vadd.f32 %v1329_v17, %v768_v22  ;;  %v642_v25 = vpop.f32.mrb[23].mxu0  ;;  %v770_v26 = vpop.f32.mrb[23].mxu1 }
 0x168   :  { %863 = vst [vmem:[#allocation7 + $0x58] sm:$0xff] %v641_v23  ;;  %895 = vst [vmem:[#allocation7 + $0x158] sm:$0xff] %v769_v24 }
 0x16b   :  { %v645_v27 = vpop.f32.mrb[24].mxu0  ;;  %v773_v28 = vpop.f32.mrb[24].mxu1 }
 0x16c   :  { %v646_v29 = vadd.f32 %v1329_v17, %v645_v27  ;;  %v774_v30 = vadd.f32 %v1329_v17, %v773_v28  ;;  %v647_v31 = vpop.f32.mrb[25].mxu0  ;;  %v775_v32 = vpop.f32.mrb[25].mxu1 }
 0x16d   :  { %v648_v33 = vpop.f32.mrb[26].mxu0  ;;  %v776_v34 = vpop.f32.mrb[26].mxu1 }
 0x16e   :  { %864 = vst [vmem:[#allocation7 + $0x60] sm:$0xff] %v646_v29  ;;  %896 = vst [vmem:[#allocation7 + $0x160] sm:$0xff] %v774_v30  ;;  %v649_v35 = vadd.f32 %v1329_v17, %v648_v33  ;;  %v777_v36 = vadd.f32 %v1329_v17, %v776_v34  ;;  %v650_v37 = vpop.f32.mrb[27].mxu0  ;;  %v778_v38 = vpop.f32.mrb[27].mxu1 }
 0x170   :  { %865 = vst [vmem:[#allocation7 + $0x68] sm:$0xff] %v649_v35  ;;  %897 = vst [vmem:[#allocation7 + $0x168] sm:$0xff] %v777_v36 }
 0x173   :  { %v653_v39 = vpop.f32.mrb[28].mxu0  ;;  %v781_v40 = vpop.f32.mrb[28].mxu1 }
 0x174   :  { %v654_v41 = vadd.f32 %v1329_v17, %v653_v39  ;;  %v782_v42 = vadd.f32 %v1329_v17, %v781_v40  ;;  %v655_v43 = vpop.f32.mrb[29].mxu0  ;;  %v783_v44 = vpop.f32.mrb[29].mxu1 }
 0x175   :  { %v656_v45 = vpop.f32.mrb[30].mxu0  ;;  %v784_v46 = vpop.f32.mrb[30].mxu1 }
 0x176   :  { %866 = vst [vmem:[#allocation7 + $0x70] sm:$0xff] %v654_v41  ;;  %898 = vst [vmem:[#allocation7 + $0x170] sm:$0xff] %v782_v42  ;;  %v657_v47 = vadd.f32 %v1329_v17, %v656_v45  ;;  %v785_v48 = vadd.f32 %v1329_v17, %v784_v46  ;;  %v658_v49 = vpop.f32.mrb[31].mxu0  ;;  %v786_v50 = vpop.f32.mrb[31].mxu1 }
 0x178   :  { %867 = vst [vmem:[#allocation7 + $0x78] sm:$0xff] %v657_v47  ;;  %899 = vst [vmem:[#allocation7 + $0x178] sm:$0xff] %v785_v48 }
 0x17b   :  { %v661_v51 = vpop.f32.mrb[32].mxu0  ;;  %v789_v52 = vpop.f32.mrb[32].mxu1 }
 0x17c   :  { %v662_v53 = vadd.f32 %v1329_v17, %v661_v51  ;;  %v790_v54 = vadd.f32 %v1329_v17, %v789_v52  ;;  %v663_v55 = vpop.f32.mrb[33].mxu0  ;;  %v791_v56 = vpop.f32.mrb[33].mxu1 }
 0x17d   :  { %v664_v57 = vpop.f32.mrb[34].mxu0  ;;  %v792_v58 = vpop.f32.mrb[34].mxu1 }
 0x17e   :  { %868 = vst [vmem:[#allocation7 + $0x80] sm:$0xff] %v662_v53  ;;  %900 = vst [vmem:[#allocation7 + $0x180] sm:$0xff] %v790_v54  ;;  %v665_v59 = vadd.f32 %v1329_v17, %v664_v57  ;;  %v793_v60 = vadd.f32 %v1329_v17, %v792_v58  ;;  %v666_v61 = vpop.f32.mrb[35].mxu0  ;;  %v794_v62 = vpop.f32.mrb[35].mxu1 }
 0x180   :  { %869 = vst [vmem:[#allocation7 + $0x88] sm:$0xff] %v665_v59  ;;  %901 = vst [vmem:[#allocation7 + $0x188] sm:$0xff] %v793_v60 }
 0x183   :  { %v669_v63 = vpop.f32.mrb[36].mxu0  ;;  %v797_v0 = vpop.f32.mrb[36].mxu1 }
 0x184   :  { %v670_v1 = vadd.f32 %v1329_v17, %v669_v63  ;;  %v798_v2 = vadd.f32 %v1329_v17, %v797_v0  ;;  %v671_v3 = vpop.f32.mrb[37].mxu0  ;;  %v799_v4 = vpop.f32.mrb[37].mxu1 }
 0x185   :  { %v672_v5 = vpop.f32.mrb[38].mxu0  ;;  %v800_v6 = vpop.f32.mrb[38].mxu1 }
 0x186   :  { %870 = vst [vmem:[#allocation7 + $0x90] sm:$0xff] %v670_v1  ;;  %902 = vst [vmem:[#allocation7 + $0x190] sm:$0xff] %v798_v2  ;;  %v673_v7 = vadd.f32 %v1329_v17, %v672_v5  ;;  %v801_v8 = vadd.f32 %v1329_v17, %v800_v6  ;;  %v674_v9 = vpop.f32.mrb[39].mxu0  ;;  %v802_v10 = vpop.f32.mrb[39].mxu1 }
 0x188   :  { %871 = vst [vmem:[#allocation7 + $0x98] sm:$0xff] %v673_v7  ;;  %903 = vst [vmem:[#allocation7 + $0x198] sm:$0xff] %v801_v8 }
 0x18b   :  { %v677_v11 = vpop.f32.mrb[40].mxu0  ;;  %v805_v12 = vpop.f32.mrb[40].mxu1 }
 0x18c   :  { %v678_v13 = vadd.f32 %v1329_v17, %v677_v11  ;;  %v806_v14 = vadd.f32 %v1329_v17, %v805_v12  ;;  %v679_v15 = vpop.f32.mrb[41].mxu0  ;;  %v807_v16 = vpop.f32.mrb[41].mxu1 }
 0x18d   :  { %v680_v18 = vpop.f32.mrb[42].mxu0  ;;  %v808_v19 = vpop.f32.mrb[42].mxu1 }
 0x18e   :  { %872 = vst [vmem:[#allocation7 + $0xa0] sm:$0xff] %v678_v13  ;;  %904 = vst [vmem:[#allocation7 + $0x1a0] sm:$0xff] %v806_v14  ;;  %v681_v20 = vadd.f32 %v1329_v17, %v680_v18  ;;  %v809_v21 = vadd.f32 %v1329_v17, %v808_v19  ;;  %v682_v22 = vpop.f32.mrb[43].mxu0  ;;  %v810_v23 = vpop.f32.mrb[43].mxu1 }
 0x190   :  { %873 = vst [vmem:[#allocation7 + $0xa8] sm:$0xff] %v681_v20  ;;  %905 = vst [vmem:[#allocation7 + $0x1a8] sm:$0xff] %v809_v21 }
 0x193   :  { %v685_v24 = vpop.f32.mrb[44].mxu0  ;;  %v813_v25 = vpop.f32.mrb[44].mxu1 }
 0x194   :  { %v686_v26 = vadd.f32 %v1329_v17, %v685_v24  ;;  %v814_v27 = vadd.f32 %v1329_v17, %v813_v25  ;;  %v687_v28 = vpop.f32.mrb[45].mxu0  ;;  %v815_v29 = vpop.f32.mrb[45].mxu1 }
 0x195   :  { %v688_v30 = vpop.f32.mrb[46].mxu0  ;;  %v816_v31 = vpop.f32.mrb[46].mxu1 }
 0x196   :  { %874 = vst [vmem:[#allocation7 + $0xb0] sm:$0xff] %v686_v26  ;;  %906 = vst [vmem:[#allocation7 + $0x1b0] sm:$0xff] %v814_v27  ;;  %v689_v32 = vadd.f32 %v1329_v17, %v688_v30  ;;  %v817_v33 = vadd.f32 %v1329_v17, %v816_v31  ;;  %v690_v34 = vpop.f32.mrb[47].mxu0  ;;  %v818_v35 = vpop.f32.mrb[47].mxu1 }
 0x198   :  { %875 = vst [vmem:[#allocation7 + $0xb8] sm:$0xff] %v689_v32  ;;  %907 = vst [vmem:[#allocation7 + $0x1b8] sm:$0xff] %v817_v33 }
 0x19b   :  { %v693_v36 = vpop.f32.mrb[48].mxu0  ;;  %v821_v37 = vpop.f32.mrb[48].mxu1 }
 0x19c   :  { %v694_v38 = vadd.f32 %v1329_v17, %v693_v36  ;;  %v822_v39 = vadd.f32 %v1329_v17, %v821_v37  ;;  %v695_v40 = vpop.f32.mrb[49].mxu0  ;;  %v823_v41 = vpop.f32.mrb[49].mxu1 }
 0x19d   :  { %v696_v42 = vpop.f32.mrb[50].mxu0  ;;  %v824_v43 = vpop.f32.mrb[50].mxu1 }
 0x19e   :  { %876 = vst [vmem:[#allocation7 + $0xc0] sm:$0xff] %v694_v38  ;;  %908 = vst [vmem:[#allocation7 + $0x1c0] sm:$0xff] %v822_v39  ;;  %v697_v44 = vadd.f32 %v1329_v17, %v696_v42  ;;  %v825_v45 = vadd.f32 %v1329_v17, %v824_v43  ;;  %v698_v46 = vpop.f32.mrb[51].mxu0  ;;  %v826_v47 = vpop.f32.mrb[51].mxu1 }
 0x1a0   :  { %877 = vst [vmem:[#allocation7 + $0xc8] sm:$0xff] %v697_v44  ;;  %909 = vst [vmem:[#allocation7 + $0x1c8] sm:$0xff] %v825_v45 }
 0x1a3   :  { %v701_v48 = vpop.f32.mrb[52].mxu0  ;;  %v829_v49 = vpop.f32.mrb[52].mxu1 }
 0x1a4   :  { %v702_v50 = vadd.f32 %v1329_v17, %v701_v48  ;;  %v830_v51 = vadd.f32 %v1329_v17, %v829_v49  ;;  %v703_v52 = vpop.f32.mrb[53].mxu0  ;;  %v831_v53 = vpop.f32.mrb[53].mxu1 }
 0x1a5   :  { %v704_v54 = vpop.f32.mrb[54].mxu0  ;;  %v832_v55 = vpop.f32.mrb[54].mxu1 }
 0x1a6   :  { %878 = vst [vmem:[#allocation7 + $0xd0] sm:$0xff] %v702_v50  ;;  %910 = vst [vmem:[#allocation7 + $0x1d0] sm:$0xff] %v830_v51  ;;  %v705_v56 = vadd.f32 %v1329_v17, %v704_v54  ;;  %v833_v57 = vadd.f32 %v1329_v17, %v832_v55  ;;  %v706_v58 = vpop.f32.mrb[55].mxu0  ;;  %v834_v59 = vpop.f32.mrb[55].mxu1 }
 0x1a8   :  { %879 = vst [vmem:[#allocation7 + $0xd8] sm:$0xff] %v705_v56  ;;  %911 = vst [vmem:[#allocation7 + $0x1d8] sm:$0xff] %v833_v57 }
 0x1ab   :  { %v709_v60 = vpop.f32.mrb[56].mxu0  ;;  %v837_v61 = vpop.f32.mrb[56].mxu1 }
 0x1ac   :  { %v710_v62 = vadd.f32 %v1329_v17, %v709_v60  ;;  %v838_v63 = vadd.f32 %v1329_v17, %v837_v61  ;;  %v711_v0 = vpop.f32.mrb[57].mxu0  ;;  %v839_v1 = vpop.f32.mrb[57].mxu1 }
 0x1ad   :  { %v712_v2 = vpop.f32.mrb[58].mxu0  ;;  %v840_v3 = vpop.f32.mrb[58].mxu1 }
 0x1ae   :  { %880 = vst [vmem:[#allocation7 + $0xe0] sm:$0xff] %v710_v62  ;;  %912 = vst [vmem:[#allocation7 + $0x1e0] sm:$0xff] %v838_v63  ;;  %v713_v4 = vadd.f32 %v1329_v17, %v712_v2  ;;  %v841_v5 = vadd.f32 %v1329_v17, %v840_v3  ;;  %v714_v6 = vpop.f32.mrb[59].mxu0  ;;  %v842_v7 = vpop.f32.mrb[59].mxu1 }
 0x1b0   :  { %881 = vst [vmem:[#allocation7 + $0xe8] sm:$0xff] %v713_v4  ;;  %913 = vst [vmem:[#allocation7 + $0x1e8] sm:$0xff] %v841_v5 }
 0x1b3   :  { %v717_v8 = vpop.f32.mrb[60].mxu0  ;;  %v845_v9 = vpop.f32.mrb[60].mxu1 }
 0x1b4   :  { %v718_v10 = vadd.f32 %v1329_v17, %v717_v8  ;;  %v846_v11 = vadd.f32 %v1329_v17, %v845_v9  ;;  %v719_v12 = vpop.f32.mrb[61].mxu0  ;;  %v847_v13 = vpop.f32.mrb[61].mxu1 }
 0x1b5   :  { %v720_v14 = vpop.f32.mrb[62].mxu0  ;;  %v848_v15 = vpop.f32.mrb[62].mxu1 }
 0x1b6   :  { %882 = vst [vmem:[#allocation7 + $0xf0] sm:$0xff] %v718_v10  ;;  %914 = vst [vmem:[#allocation7 + $0x1f0] sm:$0xff] %v846_v11  ;;  %v721_v16 = vadd.f32 %v1329_v17, %v720_v14  ;;  %v849_v18 = vadd.f32 %v1329_v17, %v848_v15  ;;  %v722_v19 = vpop.f32.mrb[63].mxu0  ;;  %v850_v20 = vpop.f32.mrb[63].mxu1 }
 0x1b8   :  { %883 = vst [vmem:[#allocation7 + $0xf8] sm:$0xff] %v721_v16  ;;  %915 = vst [vmem:[#allocation7 + $0x1f8] sm:$0xff] %v849_v18 }
 0x1b9   :  { %1222 = shalt.err (!%p1219_p6)
}
 0x1ba   :  { %s1223_s17 = scalar_lea.hbm %s1413_s3, 8192 }
 0x1bb   :  { %p1224_p7 = scmp.ne.s32.totalorder %s1413_s3, %s1223_s17  ;;  %p1227_p8 = scmp.lt.u32.totalorder %s1223_s17, %s1413_s3 }
 0x1bd   :  { %p1229_p9 = pnand %p1227_p8, %p1224_p7 }
 0x1bf   :  { %1232 = shalt.err (!%p1229_p9)
}
 0x1c0   :  { %927 = dma.vmem_to_hbm [thread:$0]  %s922_s13, 8192, %s1413_s3, [#allocation4], %s1240_s22, %s1240_s22, %s1241_s23  }
 0x1c1   :  { %1237 = dma.done.wait [#allocation4], 8192  }
 0x1c2   :  { %1238 = vsyncadd [#allocation4], 4294959104 }
 0x1c3   :  { %931 = vsyncpa [#allocation3], 1 }
 0x1c4   :  { %932 = vsyncpa [#allocation6], 1 }
 0x1c5   :  { %933 = vsyncpa [#allocation4], 1 }

</bundles_post_ra>
